<compile_context>
chip_gen: v7x
topology: tpu7x:2x2x1
jax: 0.10.0
libtpu: 0.0.40
codegen_flags: <defaults>
</compile_context>

<pallas_src>
import functools

import jax
import jax.numpy as jnp
import numpy as np
from jax import lax
from jax.experimental import pallas as pl
from jax.experimental.pallas import tpu as pltpu


def _round_up(v, m):
    return ((v + m - 1) // m) * m


def _tpu_vmem_limit_bytes():
    """Per-generation scoped-VMEM budget (conservative when unknown)."""
    kind = ""
    try:
        kind = jax.devices()[0].device_kind.lower()
    except Exception:
        pass
    if "v7" in kind or "7x" in kind:
        return 48 * 1024 * 1024      # 64 MiB physical on v7x -> leave headroom
    if "v5" in kind or "v6" in kind:
        return 96 * 1024 * 1024      # 128 MiB physical on v5e/v5p/v6e
    return 32 * 1024 * 1024          # unknown generation: stay safe


# ---------------------------------------------------------------------------
# Kernel 1: neighbor-color histogram, accumulated over edge blocks.
# ---------------------------------------------------------------------------
def hist_kernel(dst_ref, srcc_ref, hist_ref):
    """hist[n, c] += #{edges e in block : dst[e] == n, src_color[e] == c}.

    Grid axis 0 ("arbitrary") iterates lane-dense blocks of tE edges; the
    output block index is constant, so hist stays resident in VMEM and is
    written back to HBM once.
    """
    np_, fp = hist_ref.shape
    te = dst_ref.shape[1]

    @pl.when(pl.program_id(0) == 0)
    def _init():
        hist_ref[...] = jnp.zeros_like(hist_ref)

    dst = dst_ref[...]                        # (1, tE) int32, padded with NP
    srcc = srcc_ref[...]                      # (tE, 1) int32, padded with FP

    # 0/1 one-hot scatter matrices, built so the matmul below is a plain
    # (M, K) @ (K, N) contraction (no transposed-operand relayouts):
    #   DT[n, e] = [dst[e] == n]        (NP, tE)  -- LHS contracts its last dim
    #   SC[e, c] = [src_color[e] == c]  (tE, FP)  -- RHS contracts its first dim
    # Padded edges carry out-of-range indices and hit no row / column.
    dt = (dst == lax.broadcasted_iota(jnp.int32, (np_, te), 0)).astype(jnp.bfloat16)
    sc = (srcc == lax.broadcasted_iota(jnp.int32, (te, fp), 1)).astype(jnp.bfloat16)

    # bf16 is exact for 0/1 values; accumulate in f32 on the MXU.
    hist_ref[...] += jnp.dot(dt, sc, preferred_element_type=jnp.float32)


# ---------------------------------------------------------------------------
# Kernel 2: row-tiled first-occurrence search over signatures.
# ---------------------------------------------------------------------------
def first_kernel(sig_blk_ref, sigT_ref, sqn_ref, first_ref, *, n_pad):
    """first[i] = smallest node index whose signature equals node i's.

    One grid step handles tR signature rows against all NP columns; the grid
    axis is "parallel" (independent row blocks -> both v7x TensorCores).
    """
    sig_blk = sig_blk_ref[...]                                  # (tR, FP) f32
    gram = jnp.dot(sig_blk, sigT_ref[...],
                   preferred_element_type=jnp.float32)          # (tR, NP)
    d_blk = jnp.sum(sig_blk * sig_blk, axis=1, keepdims=True)   # (tR, 1)
    dist2 = d_blk + sqn_ref[...] - 2.0 * gram                   # (tR, NP)
    eq = dist2 < 0.5            # exact row equality (integer-valued signatures)

    col = lax.broadcasted_iota(jnp.float32, eq.shape, 1)
    first = jnp.min(jnp.where(eq, col, float(n_pad)),
                    axis=1, keepdims=True)                      # (tR, 1)
    first_ref[...] = first.astype(jnp.int32)


# ---------------------------------------------------------------------------
# Wrapper
# ---------------------------------------------------------------------------
def wl_encoder(x, edge_index):
    """Pallas implementation of WLencoder.forward(x, edge_index).

    x: (N, F) exactly one-hot node colors.  edge_index: (2, E) int, row0 = src,
    row1 = dst (PyG convention: neighbors of n are src of edges with dst == n).
    """
    N, F = x.shape
    E = edge_index.shape[1]

    NP = _round_up(max(N, 1), 128)           # nodes  -> lane-dense gram
    FP = _round_up(max(F, 1), 128)           # colors -> lane-dense histogram
    EP0 = _round_up(max(E, 1), 128)

    vmem_limit = _tpu_vmem_limit_bytes()

    # Edge-block size: per-grid-step overhead is ~600 cycles, so make blocks as
    # large as the (generation-dependent) VMEM budget allows, up to 4096.
    per_edge_bytes = (NP + FP) * 6           # DT/SC bf16 + bool temporaries
    te_cap = ((vmem_limit // 2) // per_edge_bytes) // 128 * 128
    tE = int(min(EP0, max(128, min(4096, te_cap))))
    EP = _round_up(EP0, tE)

    # ---- wrapper-side prep (all O(N*F + E), negligible) --------------------
    colors = jnp.argmax(x, axis=-1).astype(jnp.int32)            # (N,) own color
    src_color = colors[edge_index[0].astype(jnp.int32)]          # (E,) gathered
    dst = edge_index[1].astype(jnp.int32)

    # Padded edges use out-of-range indices -> they hit no histogram entry.
    dst_p = jnp.full((1, EP), NP, jnp.int32).at[0, :E].set(dst)
    srcc_p = jnp.full((EP, 1), FP, jnp.int32).at[:E, 0].set(src_color)

    hist = pl.pallas_call(
        hist_kernel,
        out_shape=jax.ShapeDtypeStruct((NP, FP), jnp.float32),
        grid=(EP // tE,),
        in_specs=[
            pl.BlockSpec((1, tE), lambda e: (0, e)),       # dst per edge block
            pl.BlockSpec((tE, 1), lambda e: (e, 0)),       # src colors per block
        ],
        out_specs=pl.BlockSpec((NP, FP), lambda e: (0, 0)),  # resident accumulator
        compiler_params=pltpu.CompilerParams(
            dimension_semantics=("arbitrary",),            # sequential reduction
            vmem_limit_bytes=vmem_limit,
        ),
    )(dst_p, srcc_p)

    # Signature: own color separated from the neighbor histogram by a scale
    # strictly larger than any histogram entry (max in-degree + 1, NOT E ->
    # the f32 equality test stays exact for far larger graphs).
    x_p = jnp.zeros((NP, FP), jnp.float32).at[:N, :F].set(x.astype(jnp.float32))
    scale = jnp.max(jnp.sum(hist, axis=1)) + 1.0                 # max in-degree + 1
    sig = hist + scale * x_p                                     # (NP, FP)
    sigT = sig.T                                                 # (FP, NP) MXU RHS
    sqn = jnp.sum(sig * sig, axis=1).reshape(1, NP)              # row sq-norms

    tR = 256 if NP % 256 == 0 else 128
    first = pl.pallas_call(
        functools.partial(first_kernel, n_pad=NP),
        out_shape=jax.ShapeDtypeStruct((NP, 1), jnp.int32),
        grid=(NP // tR,),
        in_specs=[
            pl.BlockSpec((tR, FP), lambda r: (r, 0)),      # signature row block
            pl.BlockSpec((FP, NP), lambda r: (0, 0)),      # sig^T, resident
            pl.BlockSpec((1, NP), lambda r: (0, 0)),       # sq-norms, resident
        ],
        out_specs=pl.BlockSpec((tR, 1), lambda r: (r, 0)),
        compiler_params=pltpu.CompilerParams(
            dimension_semantics=("parallel",),             # shard across v7x TCs
            vmem_limit_bytes=vmem_limit,
        ),
    )(sig, sigT, sqn)

    # Dict-insertion-order relabel from first-occurrence indices: O(N) scan in
    # the wrapper (cheaper than any in-kernel O(N^2) formulation).
    first = first[:N, 0]
    idx = jnp.arange(N, dtype=jnp.int32)
    is_first = (first == idx).astype(jnp.int32)
    labels = jnp.cumsum(is_first)[first] - 1
    return labels.astype(jnp.int32)


def wl_reference(x_np, edge_index_np):
    """Pure-Python replica of torch_geometric WLConv.forward semantics."""
    colors = x_np.argmax(axis=-1)
    N = x_np.shape[0]
    src, dst = edge_index_np[0], edge_index_np[1]
    hashmap = {}
    out = []
    for n in range(N):
        neigh = sorted(colors[src[dst == n]].tolist())
        key = tuple([int(colors[n])] + [int(c) for c in neigh])
        if key not in hashmap:
            hashmap[key] = len(hashmap)
        out.append(hashmap[key])
    return np.array(out, dtype=np.int32)


if __name__ == "__main__":
    key = jax.random.PRNGKey(0)
    N, F, E = 16, 8, 32
    k1, k2, k3 = jax.random.split(key, 3)

    node_colors = jax.random.randint(k1, (N,), 0, F)
    x = jax.nn.one_hot(node_colors, F, dtype=jnp.float32)        # (N, F) one-hot
    src = jax.random.randint(k2, (E,), 0, N)
    dst = jax.random.randint(k3, (E,), 0, N)
    edge_index = jnp.stack([src, dst]).astype(jnp.int32)         # (2, E)

    out = wl_encoder(x, edge_index)
    out = jax.block_until_ready(out)

    ref = wl_reference(np.asarray(x), np.asarray(edge_index))
    assert np.array_equal(np.asarray(out), ref), (np.asarray(out), ref)
    print("KERNEL_OK")
</pallas_src>

<mosaic_0001>
module attributes {stable_mosaic.version = 11 : i64} {
  func.func @hist_kernel(%arg0: i32, %arg1: memref<1x128xi32, #tpu.memory_space<vmem>>, %arg2: memref<128x1xi32, #tpu.memory_space<vmem>>, %arg3: memref<128x128xf32, #tpu.memory_space<vmem>>) attributes {dimension_semantics = [#tpu.dimension_semantics<arbitrary>], iteration_bounds = array<i64: 1>, scalar_prefetch = 0 : i64, scratch_operands = 0 : i64, tpu.core_type = #tpu.core_type<tc>, window_params = [{transform_indices = @transform_0, window_bounds = array<i64: 1, 128>}, {transform_indices = @transform_1, window_bounds = array<i64: 128, 1>}, {pipeline_mode = #tpu.pipeline_mode<synchronous>, transform_indices = @transform_2, window_bounds = array<i64: 128, 128>}]} {
    %c0_i32 = arith.constant 0 : i32
    %0 = arith.cmpi eq, %arg0, %c0_i32 : i32
    %1 = arith.extui %0 : i1 to i32
    %c0_i32_0 = arith.constant 0 : i32
    %2 = arith.cmpi ne, %1, %c0_i32_0 : i32
    scf.if %2 {
      %cst_8 = arith.constant 0.000000e+00 : f32
      %21 = vector.broadcast %cst_8 : f32 to vector<128x128xf32>
      %c0_9 = arith.constant 0 : index
      %c0_10 = arith.constant 0 : index
      %22 = vector.load %arg3[%c0_9, %c0_10] : memref<128x128xf32, #tpu.memory_space<vmem>>, vector<128x128xf32>
      tpu.vector_store %arg3[%c0_9, %c0_10], %21 {strides = array<i32>} : memref<128x128xf32, #tpu.memory_space<vmem>>, vector<128x128xf32>,
    } else {
    }
    %c0 = arith.constant 0 : index
    %c0_1 = arith.constant 0 : index
    %3 = vector.load %arg1[%c0, %c0_1] : memref<1x128xi32, #tpu.memory_space<vmem>>, vector<1x128xi32>
    %c0_2 = arith.constant 0 : index
    %c0_3 = arith.constant 0 : index
    %4 = vector.load %arg2[%c0_2, %c0_3] : memref<128x1xi32, #tpu.memory_space<vmem>>, vector<128x1xi32>
    %5 = tpu.iota {dimensions = array<i32: 0>} : vector<128x128xi32>
    %6 = vector.broadcast %3 : vector<1x128xi32> to vector<128x128xi32>
    %7 = arith.cmpi eq, %6, %5 : vector<128x128xi32>
    %8 = arith.extui %7 : vector<128x128xi1> to vector<128x128xi32>
    %9 = arith.sitofp %8 : vector<128x128xi32> to vector<128x128xf32>
    %10 = arith.truncf %9 : vector<128x128xf32> to vector<128x128xbf16>
    %11 = tpu.iota {dimensions = array<i32: 1>} : vector<128x128xi32>
    %12 = vector.broadcast %4 : vector<128x1xi32> to vector<128x128xi32>
    %13 = arith.cmpi eq, %12, %11 : vector<128x128xi32>
    %14 = arith.extui %13 : vector<128x128xi1> to vector<128x128xi32>
    %15 = arith.sitofp %14 : vector<128x128xi32> to vector<128x128xf32>
    %16 = arith.truncf %15 : vector<128x128xf32> to vector<128x128xbf16>
    %c0_4 = arith.constant 0 : index
    %c0_5 = arith.constant 0 : index
    %17 = vector.load %arg3[%c0_4, %c0_5] : memref<128x128xf32, #tpu.memory_space<vmem>>, vector<128x128xf32>
    %cst = arith.constant dense<0.000000e+00> : vector<128x128xf32>
    %18 = tpu.matmul %10, %16, %cst {dimension_numbers = #tpu.dot_dimension_numbers<[1], [0], [0], [1], [0, 0, 1, 1], [], []>} : vector<128x128xbf16>, vector<128x128xbf16>, vector<128x128xf32> -> vector<128x128xf32>
    %19 = arith.addf %17, %18 : vector<128x128xf32>
    %c0_6 = arith.constant 0 : index
    %c0_7 = arith.constant 0 : index
    %20 = vector.load %arg3[%c0_6, %c0_7] : memref<128x128xf32, #tpu.memory_space<vmem>>, vector<128x128xf32>
    tpu.vector_store %arg3[%c0_6, %c0_7], %19 {strides = array<i32>} : memref<128x128xf32, #tpu.memory_space<vmem>>, vector<128x128xf32>,
    return
  }
  func.func @transform_0(%arg0: i32) -> (i32, i32) {
    %c0_i32 = arith.constant 0 : i32
    %c0_i32_0 = arith.constant 0 : i32
    return %c0_i32, %arg0 : i32, i32
  }
  func.func @transform_1(%arg0: i32) -> (i32, i32) {
    %c0_i32 = arith.constant 0 : i32
    %c0_i32_0 = arith.constant 0 : i32
    return %arg0, %c0_i32 : i32, i32
  }
  func.func @transform_2(%arg0: i32) -> (i32, i32) {
    %c0_i32 = arith.constant 0 : i32
    %c0_i32_0 = arith.constant 0 : i32
    %c0_i32_1 = arith.constant 0 : i32
    return %c0_i32, %c0_i32_0 : i32, i32
  }
}

</mosaic_0001>

<bundles_post_ra>
// kernel: tpu_custom_call.1
= control target key start
LH: loop header
LB: loop body
LE: loop exit
PB: predicated region body
PF: predicated region fallthrough
CT: control target
= control target key end

     0   :  { %v555_v2 = vmov 0   ;;  %s732_s0 = inlined_call_operand.vmem [shape: s32[1,128], index: 0, kind: input, shape index: {}]   ;;  %s733_s1 = inlined_call_operand.vmem [shape: s32[128,1], index: 1, kind: input, shape index: {}]   ;;  %s734_s2 = inlined_call_operand.hbm [shape: f32[128,128], index: 2, kind: output, shape index: {}]  }
   0x1   :  { %v36_v0 = vld [vmem:[%s733_s1 + $0x10] sm:$0xff]  ;;  %v34_v1 = vld [vmem:[%s733_s1] sm:$0xff]  ;;  %530 = vset.pattern.permute.xlu1 %v555_v2  ;;  %529 = vset.pattern.permute.xlu0 %v555_v2  ;;  %v37_v3 = vld [vmem:[%s733_s1 + $0x18] sm:$0xff] }
   0x2   :  { %136 = vperm.xlu1 %530, %v36_v0   ;;  %130 = vperm.xlu0 %529, %v34_v1   ;;  %v35_v4 = vld [vmem:[%s733_s1 + $0x8] sm:$0xff] }
   0x3   :  { %7 = vsyncpa [#allocation3], 0  ;;  %v39_v5 = vld [vmem:[%s733_s1 + $0x28] sm:$0xff]  ;;  %v38_v6 = vld [vmem:[%s733_s1 + $0x20] sm:$0xff]  ;;  %v50_v17 = vlaneseq  ;;  %v556_v27 = vmov 1.0|1.0  }
   0x4   :  { %v41_v7 = vld [vmem:[%s733_s1 + $0x38] sm:$0xff]  ;;  %v40_v8 = vld [vmem:[%s733_s1 + $0x30] sm:$0xff]  ;;  %v43_v9 = vld [vmem:[%s733_s1 + $0x48] sm:$0xff] }
   0x5   :  { %v42_v10 = vld [vmem:[%s733_s1 + $0x40] sm:$0xff]  ;;  %v45_v11 = vld [vmem:[%s733_s1 + $0x58] sm:$0xff]  ;;  %v44_v12 = vld [vmem:[%s733_s1 + $0x50] sm:$0xff]  ;;  %v51_v18 = vshrl.u32 %v50_v17, 7  ;;  %v652_v44 = vand.u32 127, %v50_v17 }
   0x6   :  { %139 = vperm.xlu1 %530, %v37_v3   ;;  %133 = vperm.xlu0 %529, %v35_v4   ;;  %v47_v13 = vld [vmem:[%s733_s1 + $0x68] sm:$0xff]  ;;  %v46_v14 = vld [vmem:[%s733_s1 + $0x60] sm:$0xff]  ;;  %v49_v15 = vld [vmem:[%s733_s1 + $0x78] sm:$0xff] }
   0x7   :  { %v48_v16 = vld [vmem:[%s733_s1 + $0x70] sm:$0xff]  ;;  %v52_v19 = vadd.s32 8, %v51_v18  ;;  %v59_v20 = vadd.s32 64, %v51_v18  ;;  %v60_v21 = vadd.s32 72, %v51_v18  ;;  %v394_v22 = vld [vmem:[%s732_s0] ss:$0 sm:$0xff] }
   0x8   :  { %v53_v23 = vadd.s32 16, %v51_v18  ;;  %v54_v24 = vadd.s32 24, %v51_v18  ;;  %v61_v25 = vadd.s32 80, %v51_v18  ;;  %v62_v26 = vadd.s32 88, %v51_v18  ;;  %s557_s0 = smov [#allocation2]  }
   0x9   :  { %vm71_vm0 = vcmp.eq.s32.totalorder %v394_v22, %v51_v18  ;;  %vm72_vm1 = vcmp.eq.s32.totalorder %v394_v22, %v52_v19  ;;  %vm79_vm2 = vcmp.eq.s32.totalorder %v394_v22, %v59_v20  ;;  %vm80_vm3 = vcmp.eq.s32.totalorder %v394_v22, %v60_v21  ;;  %s383_s1 = sshll.u32 %s557_s0, 4  ;;  %s384_s1 = int_to_ptr.vmem [resolvable:$true] %s383_s1 }
   0xa   :  { %145 = vperm.xlu1 %530, %v39_v5   ;;  %142 = vperm.xlu0 %529, %v38_v6   ;;  %vm443_vm4 = vmpackc.low %vm72_vm1, %vm71_vm0  ;;  %vm73_vm5 = vcmp.eq.s32.totalorder %v394_v22, %v53_v23  ;;  %vm74_vm6 = vcmp.eq.s32.totalorder %v394_v22, %v54_v24  ;;  %vm81_vm7 = vcmp.eq.s32.totalorder %v394_v22, %v61_v25  ;;  %v55_v29 = vadd.s32 32, %v51_v18  ;;  %s531_s15 = scalar_lea.vmem %s384_s1, 2048  ;;  %p536_p1 = scmp.lt.s32.totalorder %s384_s1, %s384_s1 }
   0xb   :  { %vm82_vm8 = vcmp.eq.s32.totalorder %v394_v22, %v62_v26  ;;  %491 = vmatprep.mubr.msk.bf16.mxu0 %vm443_vm4, %v556_v27  ;;  %vm451_vm9 = vmpackc.low %vm80_vm3, %vm79_vm2  ;;  %v56_v30 = vadd.s32 40, %v51_v18  ;;  %v63_v32 = vadd.s32 96, %v51_v18  ;;  %v64_v33 = vadd.s32 104, %v51_v18  ;;  %p532_p0 = scmp.ne.s32.totalorder %s384_s1, %s531_s15  ;;  %p537_p2 = scmp.lt.s32.totalorder %s531_s15, %s531_s15 }
   0xc   :  { %499 = vmatprep.mubr.msk.bf16.mxu1 %vm451_vm9, %v556_v27  ;;  %vm628_vm10 = vmpackc.low %vm74_vm6, %vm73_vm5  ;;  %v57_v34 = vadd.s32 48, %v51_v18  ;;  %v58_v35 = vadd.s32 56, %v51_v18  ;;  %vm75_vm12 = vcmp.eq.s32.totalorder %v394_v22, %v55_v29  ;;  %v65_v38 = vadd.s32 112, %v51_v18 }
   0xd   :  { %vm632_vm11 = vmpackc.low %vm82_vm8, %vm81_vm7  ;;  %vm76_vm13 = vcmp.eq.s32.totalorder %v394_v22, %v56_v30  ;;  %vm83_vm15 = vcmp.eq.s32.totalorder %v394_v22, %v63_v32  ;;  %vm84_vm0 = vcmp.eq.s32.totalorder %v394_v22, %v64_v33  ;;  %v66_v39 = vadd.s32 120, %v51_v18  ;;  %p538_p3 = por %p537_p2, %p536_p1 }
   0xe   :  { %151 = vperm.xlu1 %530, %v41_v7   ;;  %148 = vperm.xlu0 %529, %v40_v8   ;;  %vm636_vm14 = vmpackc.low %vm76_vm13, %vm75_vm12  ;;  %vm77_vm1 = vcmp.eq.s32.totalorder %v394_v22, %v57_v34  ;;  %vm78_vm2 = vcmp.eq.s32.totalorder %v394_v22, %v58_v35  ;;  %vm85_vm5 = vcmp.eq.s32.totalorder %v394_v22, %v65_v38 }
   0xf   :  { %vm640_vm3 = vmpackc.low %vm84_vm0, %vm83_vm15  ;;  %vm86_vm6 = vcmp.eq.s32.totalorder %v394_v22, %v66_v39  ;;  %p539_p4 = pnand %p538_p3, %p532_p0 }
  0x10   :  { %vm644_vm4 = vmpackc.low %vm78_vm2, %vm77_vm1 }
  0x11   :  { %vm648_vm7 = vmpackc.low %vm86_vm6, %vm85_vm5 }
  0x12   :  { %157 = vperm.xlu1 %530, %v43_v9   ;;  %154 = vperm.xlu0 %529, %v42_v10  }
  0x16   :  { %163 = vperm.xlu1 %530, %v45_v11   ;;  %160 = vperm.xlu0 %529, %v44_v12  }
  0x1a   :  { %169 = vperm.xlu1 %530, %v47_v13   ;;  %166 = vperm.xlu0 %529, %v46_v14  }
  0x1e   :  { %175 = vperm.xlu1 %530, %v49_v15   ;;  %172 = vperm.xlu0 %529, %v48_v16  }
  0x81   :  { %v137_v42 = vpop.permute.xlu1 %136  ;;  %v131_v43 = vpop.permute.xlu0 %130 }
  0x82   :  { %vm179_vm9 = vcmp.eq.s32.totalorder %v137_v42, %v652_v44  ;;  %vm177_vm12 = vcmp.eq.s32.totalorder %v131_v43, %v652_v44 }
  0x85   :  { %v140_v45 = vpop.permute.xlu1 %139  ;;  %v134_v46 = vpop.permute.xlu0 %133 }
  0x86   :  { %vm178_vm8 = vcmp.eq.s32.totalorder %v134_v46, %v652_v44  ;;  %vm180_vm13 = vcmp.eq.s32.totalorder %v140_v45, %v652_v44 }
  0x87   :  { %vm427_vm15 = vmpackc.low %vm178_vm8, %vm177_vm12 }
  0x88   :  { %475 = vmatprep.subr.msk.bf16.mxu0 %vm427_vm15, %v556_v27  ;;  %507 = vmatprep.subr.msk.bf16.mxu1 %vm427_vm15, %v556_v27  ;;  %vm429_vm0 = vmpackc.low %vm180_vm13, %vm179_vm9 }
  0x89   :  { %v146_v47 = vpop.permute.xlu1 %145  ;;  %v143_v48 = vpop.permute.xlu0 %142  ;;  %476 = vmatpush3.bf16.msk.msra.mxu0 %vm427_vm15, %v556_v27  ;;  %515 = vmatpush3.bf16.msk.msra.mxu1 %vm427_vm15, %v556_v27 }
  0x8a   :  { %vm182_vm1 = vcmp.eq.s32.totalorder %v146_v47, %v652_v44  ;;  %vm181_vm2 = vcmp.eq.s32.totalorder %v143_v48, %v652_v44  ;;  %477 = vmatprep.subr.msk.bf16.mxu0 %vm429_vm0, %v556_v27  ;;  %508 = vmatprep.subr.msk.bf16.mxu1 %vm429_vm0, %v556_v27 }
  0x8b   :  { %vm431_vm5 = vmpackc.low %vm182_vm1, %vm181_vm2 }
  0x8d   :  { %v152_v49 = vpop.permute.xlu1 %151  ;;  %v149_v50 = vpop.permute.xlu0 %148  ;;  %478 = vmatpush3.bf16.msk.msra.mxu0 %vm429_vm0, %v556_v27  ;;  %516 = vmatpush3.bf16.msk.msra.mxu1 %vm429_vm0, %v556_v27 }
  0x8e   :  { %vm184_vm6 = vcmp.eq.s32.totalorder %v152_v49, %v652_v44  ;;  %vm183_vm8 = vcmp.eq.s32.totalorder %v149_v50, %v652_v44  ;;  %479 = vmatprep.subr.msk.bf16.mxu0 %vm431_vm5, %v556_v27  ;;  %509 = vmatprep.subr.msk.bf16.mxu1 %vm431_vm5, %v556_v27 }
  0x8f   :  { %vm433_vm9 = vmpackc.low %vm184_vm6, %vm183_vm8 }
  0x91   :  { %v158_v51 = vpop.permute.xlu1 %157  ;;  %v155_v52 = vpop.permute.xlu0 %154  ;;  %480 = vmatpush3.bf16.msk.msra.mxu0 %vm431_vm5, %v556_v27  ;;  %517 = vmatpush3.bf16.msk.msra.mxu1 %vm431_vm5, %v556_v27 }
  0x92   :  { %vm186_vm12 = vcmp.eq.s32.totalorder %v158_v51, %v652_v44  ;;  %vm185_vm13 = vcmp.eq.s32.totalorder %v155_v52, %v652_v44  ;;  %481 = vmatprep.subr.msk.bf16.mxu0 %vm433_vm9, %v556_v27  ;;  %510 = vmatprep.subr.msk.bf16.mxu1 %vm433_vm9, %v556_v27 }
  0x93   :  { %vm435_vm15 = vmpackc.low %vm186_vm12, %vm185_vm13 }
  0x95   :  { %v164_v53 = vpop.permute.xlu1 %163  ;;  %v161_v54 = vpop.permute.xlu0 %160  ;;  %482 = vmatpush3.bf16.msk.msra.mxu0 %vm433_vm9, %v556_v27  ;;  %518 = vmatpush3.bf16.msk.msra.mxu1 %vm433_vm9, %v556_v27 }
  0x96   :  { %vm188_vm0 = vcmp.eq.s32.totalorder %v164_v53, %v652_v44  ;;  %vm187_vm1 = vcmp.eq.s32.totalorder %v161_v54, %v652_v44  ;;  %483 = vmatprep.subr.msk.bf16.mxu0 %vm435_vm15, %v556_v27  ;;  %511 = vmatprep.subr.msk.bf16.mxu1 %vm435_vm15, %v556_v27 }
  0x97   :  { %vm437_vm2 = vmpackc.low %vm188_vm0, %vm187_vm1 }
  0x99   :  { %v170_v55 = vpop.permute.xlu1 %169  ;;  %v167_v56 = vpop.permute.xlu0 %166  ;;  %484 = vmatpush3.bf16.msk.msra.mxu0 %vm435_vm15, %v556_v27  ;;  %519 = vmatpush3.bf16.msk.msra.mxu1 %vm435_vm15, %v556_v27 }
  0x9a   :  { %vm190_vm5 = vcmp.eq.s32.totalorder %v170_v55, %v652_v44  ;;  %vm189_vm6 = vcmp.eq.s32.totalorder %v167_v56, %v652_v44  ;;  %485 = vmatprep.subr.msk.bf16.mxu0 %vm437_vm2, %v556_v27  ;;  %512 = vmatprep.subr.msk.bf16.mxu1 %vm437_vm2, %v556_v27 }
  0x9b   :  { %vm439_vm8 = vmpackc.low %vm190_vm5, %vm189_vm6 }
  0x9d   :  { %v176_v57 = vpop.permute.xlu1 %175  ;;  %v173_v58 = vpop.permute.xlu0 %172  ;;  %486 = vmatpush3.bf16.msk.msra.mxu0 %vm437_vm2, %v556_v27  ;;  %520 = vmatpush3.bf16.msk.msra.mxu1 %vm437_vm2, %v556_v27 }
  0x9e   :  { %vm192_vm9 = vcmp.eq.s32.totalorder %v176_v57, %v652_v44  ;;  %vm191_vm12 = vcmp.eq.s32.totalorder %v173_v58, %v652_v44  ;;  %487 = vmatprep.subr.msk.bf16.mxu0 %vm439_vm8, %v556_v27  ;;  %513 = vmatprep.subr.msk.bf16.mxu1 %vm439_vm8, %v556_v27 }
  0x9f   :  { %vm441_vm13 = vmpackc.low %vm192_vm9, %vm191_vm12 }
  0xa1   :  { %488 = vmatpush3.bf16.msk.msra.mxu0 %vm439_vm8, %v556_v27  ;;  %521 = vmatpush3.bf16.msk.msra.mxu1 %vm439_vm8, %v556_v27 }
  0xa2   :  { %489 = vmatprep.subr.msk.bf16.mxu0 %vm441_vm13, %v556_v27  ;;  %514 = vmatprep.subr.msk.bf16.mxu1 %vm441_vm13, %v556_v27 }
  0xa5   :  { %490 = vmatpush3.bf16.msk.msra.mxu0 %vm441_vm13, %v556_v27  ;;  %522 = vmatpush3.bf16.msk.msra.mxu1 %vm441_vm13, %v556_v27 }
  0xa8   :  { %492 = vmatmul.mubr.msk.bf16.vlgmr.msra.gmra.mrb[0].mxu0 %vm628_vm10, %v556_v27  ;;  %500 = vmatmul.mubr.msk.bf16.vlgmr.msra.gmra.mrb[0].mxu1 %vm632_vm11, %v556_v27 }
  0xa9   :  { %495 = vmatprep.mubr.msk.bf16.mxu0 %vm636_vm14, %v556_v27  ;;  %503 = vmatprep.mubr.msk.bf16.mxu1 %vm640_vm3, %v556_v27 }
  0xb0   :  { %496 = vmatmul.mubr.msk.bf16.gmra.mrb[4].mxu0 %vm644_vm4, %v556_v27  ;;  %504 = vmatmul.mubr.msk.bf16.gmra.mrb[4].mxu1 %vm648_vm7, %v556_v27 }
 0x17b   :  { %v493_v59 = vpop.f32.mrb[0].mxu0  ;;  %v501_v60 = vpop.f32.mrb[0].mxu1 }
 0x17c   :  { %v283_v61 = vpop.f32.mrb[1].mxu0  ;;  %v315_v62 = vpop.f32.mrb[1].mxu1  ;;  %364 = vst [vmem:[#allocation2 + $0x10] sm:$0xff] %v493_v59  ;;  %372 = vst [vmem:[#allocation2 + $0x50] sm:$0xff] %v501_v60 }
 0x17d   :  { %v494_v63 = vpop.f32.mrb[2].mxu0  ;;  %v502_v0 = vpop.f32.mrb[2].mxu1  ;;  %362 = vst [vmem:[#allocation2] sm:$0xff] %v283_v61  ;;  %370 = vst [vmem:[#allocation2 + $0x40] sm:$0xff] %v315_v62 }
 0x17e   :  { %v286_v1 = vpop.f32.mrb[3].mxu0  ;;  %v318_v2 = vpop.f32.mrb[3].mxu1  ;;  %365 = vst [vmem:[#allocation2 + $0x18] sm:$0xff] %v494_v63  ;;  %373 = vst [vmem:[#allocation2 + $0x58] sm:$0xff] %v502_v0 }
 0x17f   :  { %363 = vst [vmem:[#allocation2 + $0x8] sm:$0xff] %v286_v1  ;;  %371 = vst [vmem:[#allocation2 + $0x48] sm:$0xff] %v318_v2 }
 0x183   :  { %v497_v3 = vpop.f32.mrb[4].mxu0  ;;  %v505_v4 = vpop.f32.mrb[4].mxu1 }
 0x184   :  { %v299_v5 = vpop.f32.mrb[5].mxu0  ;;  %v331_v6 = vpop.f32.mrb[5].mxu1  ;;  %368 = vst [vmem:[#allocation2 + $0x30] sm:$0xff] %v497_v3  ;;  %376 = vst [vmem:[#allocation2 + $0x70] sm:$0xff] %v505_v4 }
 0x185   :  { %v498_v7 = vpop.f32.mrb[6].mxu0  ;;  %v506_v8 = vpop.f32.mrb[6].mxu1  ;;  %366 = vst [vmem:[#allocation2 + $0x20] sm:$0xff] %v299_v5  ;;  %374 = vst [vmem:[#allocation2 + $0x60] sm:$0xff] %v331_v6 }
 0x186   :  { %v302_v9 = vpop.f32.mrb[7].mxu0  ;;  %v334_v10 = vpop.f32.mrb[7].mxu1  ;;  %369 = vst [vmem:[#allocation2 + $0x38] sm:$0xff] %v498_v7  ;;  %377 = vst [vmem:[#allocation2 + $0x78] sm:$0xff] %v506_v8 }
 0x187   :  { %367 = vst [vmem:[#allocation2 + $0x28] sm:$0xff] %v302_v9  ;;  %375 = vst [vmem:[#allocation2 + $0x68] sm:$0xff] %v334_v10 }
 0x188   :  { %542 = shalt.err (!%p539_p4)
}
 0x189   :  { %s543_s18 = scalar_lea.hbm %s734_s2, 2048 }
 0x18a   :  { %p544_p5 = scmp.ne.s32.totalorder %s734_s2, %s543_s18  ;;  %p547_p6 = scmp.lt.u32.totalorder %s543_s18, %s734_s2 }
 0x18c   :  { %p549_p7 = pnand %p547_p6, %p544_p5 }
 0x18e   :  { %552 = shalt.err (!%p549_p7)
}
 0x18f   :  { %s558_s23 = smov 128   ;;  %s559_s24 = smov 8  }
 0x190   :  { %389 = dma.vmem_to_hbm [thread:$0]  %s384_s1, 2048, %s734_s2, [#allocation3], %s558_s23, %s558_s23, %s559_s24  }
 0x191   :  { %553 = dma.done.wait [#allocation3], 2048  }
 0x192   :  { %554 = vsyncadd [#allocation3], 4294965248 }
 0x193   :  { %393 = vsyncpa [#allocation3], 1 }

</bundles_post_ra>
